<compile_context>
chip_gen: v5e
topology: v5e:2x2
jax: 0.10.0
libtpu: 0.0.40
codegen_flags: <defaults>
</compile_context>

<pallas_src>
import math
import functools

import jax
import jax.numpy as jnp
from jax.experimental import pallas as pl
from jax.experimental.pallas import tpu as pltpu


def _token_embed_kernel(x_ref, w_ref, o_ref):
    """One (batch-block b, d_model-tile n) grid step.

    x_ref: (TB, L, c_in)   TB full sequences (VMEM-resident across the inner n loop)
    w_ref: (3*c_in, TN)    fused conv weight slice: row k*c_in + c == W[o, c, k]
    o_ref: (TB, L, TN)     output tile
    """
    tb, seq, c = x_ref.shape
    tn = o_ref.shape[-1]
    x = x_ref[...]                                   # (TB, L, C)

    # Circular taps, built on-chip per batch row (roll along axis=1 so nothing wraps
    # across batches inside the block).
    x_prev = jnp.roll(x, 1, axis=1)                  # x[(t-1) % L]  -> weight tap k=0
    x_next = jnp.roll(x, -1, axis=1)                 # x[(t+1) % L]  -> weight tap k=2

    # Fuse the three K=c_in matmuls into one K=3*c_in matmul (single MXU pass,
    # single f32 accumulator) by concatenating the taps along the contraction dim.
    m = tb * seq
    xcat = jnp.concatenate(
        [x_prev.reshape(m, c), x.reshape(m, c), x_next.reshape(m, c)], axis=-1)

    acc = jnp.dot(xcat, w_ref[...], preferred_element_type=jnp.float32)  # (M, TN)
    o_ref[...] = acc.reshape(tb, seq, tn).astype(o_ref.dtype)


def _vmem_capacity_bytes():
    """Per-core VMEM capacity; conservative 64 MiB (v7x) fallback."""
    try:
        info = pltpu.get_tpu_info()
        for name in ("vmem_capacity_bytes", "vmem_bytes", "vmem_size_bytes"):
            v = getattr(info, name, None)
            if v:
                return int(v)
    except Exception:
        pass
    return 64 << 20


def _vmem_need(tb, tn, seq, c_in, in_isz, out_isz):
    """Double-buffered block bytes + in-kernel temporaries, with (8,128) padding."""
    pad = lambda v, m: -(-v // m) * m
    x_blk = tb * pad(seq, 8) * pad(c_in, 128) * in_isz
    w_blk = pad(3 * c_in, 8) * pad(tn, 128) * in_isz
    o_blk = tb * pad(seq, 8) * pad(tn, 128) * out_isz
    tmp = (4 * tb * pad(seq, 8) * pad(3 * c_in, 128) * 4      # taps + xcat (f32)
           + tb * pad(seq, 8) * pad(tn, 128) * 4)             # f32 accumulator
    return 2 * (x_blk + w_blk + o_blk) + tmp


def _choose_tiles(B, seq, c_in, d_model, in_isz, out_isz, budget):
    """Pick (TB, TN): big, lane-dense, VMEM-budgeted, >= 2 grid steps when possible."""
    # TN candidates: full d_model (contiguous HBM stores) first, then multiples of
    # 256 (v6e/v7x 256-wide MXU), then 128 (lane-dense stores on v5e).
    tn_opts = [d_model]
    if d_model % 256 == 0:
        tn_opts += [t for t in range(d_model - 256, 0, -256) if d_model % t == 0]
    if d_model % 128 == 0:
        tn_opts += [t for t in range(d_model - 128, 0, -128) if d_model % t == 0]
    tn_opts = sorted(set(tn_opts), reverse=True)

    # Batch blocking only when L is sublane-aligned (in-kernel reshape stays trivial).
    tb_opts = ([t for t in range(B, 0, -1) if B % t == 0] if seq % 8 == 0 else [1])

    tn = next((t for t in tn_opts
               if _vmem_need(1, t, seq, c_in, in_isz, out_isz) <= budget), tn_opts[-1])
    tb = next((t for t in tb_opts
               if _vmem_need(t, tn, seq, c_in, in_isz, out_isz) <= budget), 1)

    # v7x has two TensorCores: keep >= 2 steps along a "parallel" axis when possible.
    if (B // tb) * (d_model // tn) < 2:
        if tb > 1:
            tb = max(t for t in tb_opts if t < tb)
        elif len(tn_opts) > 1:
            tn = tn_opts[1]
    return tb, tn


@functools.partial(jax.jit, static_argnames=("block_b", "block_n", "out_dtype"))
def token_embedding_forward(x, weight, *, block_b=None, block_n=None, out_dtype=None):
    """
    x:      (B, L, c_in)        float32 (bf16 also accepted)
    weight: (d_model, c_in, 3)  PyTorch Conv1d weight layout (out, in, k)
    out_dtype: None (= x.dtype, preserves module numerics) or e.g. jnp.bfloat16 to
               halve HBM write traffic (f32 accumulation is kept either way).
    returns (B, L, d_model)
    """
    B, seq, c_in = x.shape
    d_model, c_in_w, K = weight.shape
    assert c_in_w == c_in and K == 3
    out_dtype = x.dtype if out_dtype is None else jnp.dtype(out_dtype)

    # Fused weight: w_cat[k*c_in + c, o] = W[o, c, k]  -> single K = 3*c_in matmul.
    w_cat = jnp.transpose(weight, (2, 1, 0)).reshape(3 * c_in, d_model)

    in_isz = x.dtype.itemsize
    out_isz = jnp.dtype(out_dtype).itemsize
    cap = _vmem_capacity_bytes()
    budget = min(cap // 2, 32 << 20)

    tb_auto, tn_auto = _choose_tiles(B, seq, c_in, d_model, in_isz, out_isz, budget)
    tb = int(block_b) if block_b is not None else tb_auto
    tn = int(block_n) if block_n is not None else tn_auto
    assert B % tb == 0, "block_b must divide the batch size"
    assert d_model % tn == 0, "block_n must divide d_model"
    assert tb == 1 or seq % 8 == 0, "batch blocking requires L % 8 == 0"
    b_blocks, n_tiles = B // tb, d_model // tn

    need = _vmem_need(tb, tn, seq, c_in, in_isz, out_isz)
    vmem_limit = int(min(max(2 * need, need + (8 << 20), 32 << 20), cap * 3 // 4))

    flops = 2 * B * seq * (3 * c_in) * d_model
    w_reads = b_blocks if n_tiles > 1 else 1     # weight re-DMA'd per batch block
    bytes_accessed = (x.size * in_isz
                      + w_cat.size * w_cat.dtype.itemsize * w_reads
                      + B * seq * d_model * out_isz)

    return pl.pallas_call(
        _token_embed_kernel,
        out_shape=jax.ShapeDtypeStruct((B, seq, d_model), out_dtype),
        grid_spec=pltpu.PrefetchScalarGridSpec(
            num_scalar_prefetch=0,
            grid=(b_blocks, n_tiles),
            in_specs=[
                # TB full sequences; block index ignores n, so the x block stays
                # VMEM-resident (no re-DMA) across the inner d_model-tile loop.
                pl.BlockSpec((tb, seq, c_in), lambda b, n: (b, 0, 0)),
                # Fused weight slice for this d_model tile (tiny).
                pl.BlockSpec((3 * c_in, tn), lambda b, n: (0, n)),
            ],
            out_specs=pl.BlockSpec((tb, seq, tn), lambda b, n: (b, 0, n)),
        ),
        compiler_params=pltpu.CompilerParams(
            dimension_semantics=("parallel", "parallel"),
            vmem_limit_bytes=vmem_limit,
        ),
        cost_estimate=pl.CostEstimate(
            flops=flops, transcendentals=0, bytes_accessed=bytes_accessed
        ),
    )(x, w_cat)


def init_weight(key, c_in, d_model, kernel_size=3):
    # kaiming_normal_(mode='fan_in', nonlinearity='leaky_relu'), default slope=0.01
    fan_in = c_in * kernel_size
    gain = math.sqrt(2.0 / (1.0 + 0.01 ** 2))
    std = gain / math.sqrt(fan_in)
    return std * jax.random.normal(key, (d_model, c_in, kernel_size), jnp.float32)


def _reference(x, weight):
    # Pure-JAX reference of the circular conv (padding=1, k=3, no bias).
    B, L, c_in = x.shape
    d_model, _, K = weight.shape
    out = jnp.zeros((B, L, d_model), jnp.float32)
    for k in range(K):
        xk = jnp.roll(x, shift=1 - k, axis=1)          # (B, L, c_in)
        out = out + jnp.einsum("blc,oc->blo", xk, weight[:, :, k])
    return out


if __name__ == "__main__":
    key = jax.random.PRNGKey(0)
    k_x1, k_w1, k_x2, k_w2 = jax.random.split(key, 4)

    # Case 1: module-scale shapes (batch=2, seq=16, c_in=4, d_model=32), auto tiling.
    B, L, C, D = 2, 16, 4, 32
    x1 = jax.random.normal(k_x1, (B, L, C), jnp.float32)
    w1 = init_weight(k_w1, C, D)
    out1 = jax.block_until_ready(token_embedding_forward(x1, w1))
    ref1 = _reference(x1, w1)
    assert out1.shape == (B, L, D) and out1.dtype == jnp.float32
    assert jnp.allclose(out1, ref1, atol=1e-4, rtol=1e-4), float(jnp.abs(out1 - ref1).max())

    # Case 2: batch blocking + lane-dense d_model tiling (grid (2, 2): TB=2, TN=128).
    B2, L2, C2, D2 = 4, 8, 4, 256
    x2 = jax.random.normal(k_x2, (B2, L2, C2), jnp.float32)
    w2 = init_weight(k_w2, C2, D2)
    out2 = jax.block_until_ready(token_embedding_forward(x2, w2, block_b=2, block_n=128))
    ref2 = _reference(x2, w2)
    assert out2.shape == (B2, L2, D2)
    assert jnp.allclose(out2, ref2, atol=1e-4, rtol=1e-4), float(jnp.abs(out2 - ref2).max())

    # Case 3: bf16-output flag (halves HBM write traffic; f32 MXU accumulation kept).
    out3 = jax.block_until_ready(
        token_embedding_forward(x2, w2, out_dtype=jnp.bfloat16))
    assert out3.dtype == jnp.bfloat16
    assert jnp.allclose(out3.astype(jnp.float32), ref2, atol=3e-2, rtol=3e-2)

    print("KERNEL_OK")
</pallas_src>

<mosaic_0001>
module attributes {stable_mosaic.version = 11 : i64} {
  func.func @_token_embed_kernel(%arg0: i32, %arg1: i32, %arg2: memref<1x16x4xf32, #tpu.memory_space<vmem>>, %arg3: memref<12x32xf32, #tpu.memory_space<vmem>>, %arg4: memref<1x16x32xf32, #tpu.memory_space<vmem>>) attributes {dimension_semantics = [#tpu.dimension_semantics<parallel>, #tpu.dimension_semantics<parallel>], iteration_bounds = array<i64: 2, 1>, scalar_prefetch = 0 : i64, scratch_operands = 0 : i64, tpu.core_type = #tpu.core_type<tc>, window_params = [{transform_indices = @transform_0, window_bounds = array<i64: 1, 16, 4>}, {transform_indices = @transform_1, window_bounds = array<i64: 12, 32>}, {transform_indices = @transform_2, window_bounds = array<i64: 1, 16, 32>}]} {
    %c0 = arith.constant 0 : index
    %c0_0 = arith.constant 0 : index
    %c0_1 = arith.constant 0 : index
    %0 = vector.load %arg2[%c0, %c0_0, %c0_1] : memref<1x16x4xf32, #tpu.memory_space<vmem>>, vector<1x16x4xf32>
    %1 = vector.extract_strided_slice %0 {offsets = [0, 15, 0], sizes = [1, 1, 4], strides = [1, 1, 1]} : vector<1x16x4xf32> to vector<1x1x4xf32>
    %2 = vector.extract_strided_slice %0 {offsets = [0, 0, 0], sizes = [1, 15, 4], strides = [1, 1, 1]} : vector<1x16x4xf32> to vector<1x15x4xf32>
    %3 = tpu.concatenate %1, %2 in 1 : vector<1x1x4xf32>, vector<1x15x4xf32> -> vector<1x16x4xf32>
    %4 = vector.extract_strided_slice %0 {offsets = [0, 1, 0], sizes = [1, 15, 4], strides = [1, 1, 1]} : vector<1x16x4xf32> to vector<1x15x4xf32>
    %5 = vector.extract_strided_slice %0 {offsets = [0, 0, 0], sizes = [1, 1, 4], strides = [1, 1, 1]} : vector<1x16x4xf32> to vector<1x1x4xf32>
    %6 = tpu.concatenate %4, %5 in 1 : vector<1x15x4xf32>, vector<1x1x4xf32> -> vector<1x16x4xf32>
    %7 = vector.shape_cast %3 : vector<1x16x4xf32> to vector<16x4xf32>
    %8 = vector.shape_cast %0 : vector<1x16x4xf32> to vector<16x4xf32>
    %9 = vector.shape_cast %6 : vector<1x16x4xf32> to vector<16x4xf32>
    %10 = tpu.concatenate %7, %8, %9 in 1 : vector<16x4xf32>, vector<16x4xf32>, vector<16x4xf32> -> vector<16x12xf32>
    %c0_2 = arith.constant 0 : index
    %c0_3 = arith.constant 0 : index
    %11 = vector.load %arg3[%c0_2, %c0_3] : memref<12x32xf32, #tpu.memory_space<vmem>>, vector<12x32xf32>
    %cst = arith.constant dense<0.000000e+00> : vector<16x32xf32>
    %12 = tpu.matmul %10, %11, %cst {dimension_numbers = #tpu.dot_dimension_numbers<[1], [0], [0], [1], [0, 0, 1, 1], [], []>} : vector<16x12xf32>, vector<12x32xf32>, vector<16x32xf32> -> vector<16x32xf32>
    %13 = vector.shape_cast %12 : vector<16x32xf32> to vector<1x16x32xf32>
    %c0_4 = arith.constant 0 : index
    %c0_5 = arith.constant 0 : index
    %c0_6 = arith.constant 0 : index
    %14 = vector.load %arg4[%c0_4, %c0_5, %c0_6] : memref<1x16x32xf32, #tpu.memory_space<vmem>>, vector<1x16x32xf32>
    tpu.vector_store %arg4[%c0_4, %c0_5, %c0_6], %13 {strides = array<i32>} : memref<1x16x32xf32, #tpu.memory_space<vmem>>, vector<1x16x32xf32>,
    return
  }
  func.func @transform_0(%arg0: i32, %arg1: i32) -> (i32, i32, i32) {
    %c0_i32 = arith.constant 0 : i32
    %c0_i32_0 = arith.constant 0 : i32
    %c0_i32_1 = arith.constant 0 : i32
    return %arg0, %c0_i32, %c0_i32_0 : i32, i32, i32
  }
  func.func @transform_1(%arg0: i32, %arg1: i32) -> (i32, i32) {
    %c0_i32 = arith.constant 0 : i32
    %c0_i32_0 = arith.constant 0 : i32
    return %c0_i32, %arg1 : i32, i32
  }
  func.func @transform_2(%arg0: i32, %arg1: i32) -> (i32, i32, i32) {
    %c0_i32 = arith.constant 0 : i32
    %c0_i32_0 = arith.constant 0 : i32
    return %arg0, %c0_i32, %arg1 : i32, i32, i32
  }
}

</mosaic_0001>

<bundles_post_ra>
// kernel: token_embedding_forward.1
= control target key start
LH: loop header
LB: loop body
LE: loop exit
PB: predicated region body
PF: predicated region fallthrough
CT: control target
= control target key end

     0   :  { %7 = vsyncpa [#allocation3], 0  ;;  %s637_s0 = inlined_call_operand.vmem [shape: f32[2,16,4], index: 0, kind: input, shape index: {}]   ;;  %s638_s1 = inlined_call_operand.vmem [shape: f32[12,32], index: 1, kind: input, shape index: {}]   ;;  %s639_s2 = inlined_call_operand.hbm [shape: f32[2,16,32], index: 2, kind: output, shape index: {}]  }
   0x1   :  { %9 = vsyncpa [#allocation3 + $0x1], 0  ;;  %s531_s9 = smov 0   ;;  %s533_s10 = smov 0  }
   0x2   :  { %s535_s11 = smov 0   ;;  %s537_s12 = smov 0  }
   0x3   :  { %s539_s13 = smov 0   ;;  %s541_s14 = smov 0  }
   0x4 LB: > { %s354_s15 = sadd.s32 4294967295, %s511_s14   ;;  %s355_s16 = sadd.s32 4294967294, %s511_s14   ;;  %s511_s14 = sphi %s541_s14, %s15_s14   ;;  %s507_s13 = sphi %s539_s13, %s646_s13   ;;  %s503_s12 = sphi %s537_s12, %s645_s12   ;;  %s499_s11 = sphi %s535_s11, %s644_s11   ;;  %s495_s10 = sphi %s533_s10, %s643_s10   ;;  %s491_s9 = sphi %s531_s9, %s642_s9  }
   0x5   : > { %s27_s17 = sadd.s32 1, %s507_s13  ;;  %s88_s18 = sadd.s32 1, %s499_s11 }
   0x6   : > { %p29_p0 = scmp.ge.s32.totalorder %s27_s17, 2  ;;  %p98_p1 = scmp.ne.s32.totalorder %s499_s11, %s495_s10 }
   0x7   : > { %p99_p2 = scmp.eq.s32.totalorder %s354_s15, 1  ;;  %p104_p3 = scmp.ne.s32.totalorder %s495_s10, %s491_s9 }
   0x8   : > { %s648_s17 = smov (%p29_p0, %s27_s17), 0  ;;  %p105_p5 = scmp.eq.s32.totalorder %s355_s16, 1 }
   0x9   : > { %p571_p4 = por %p99_p2, %p98_p1  ;;  %s83_s20 = ssub.s32 %s507_s13, %s648_s17 }
   0xa   : > { %p359_p6 = scmp.ge.s32.totalorder %s511_s14, 1  ;;  %p86_p7 = scmp.eq.s32.totalorder %s83_s20, 0 }
   0xb   : > { %p578_p8 = por %p105_p5, %p104_p3  ;;  %p138_p9 = scmp.lt.s32.totalorder %s511_s14, 3 }
   0xc   : > { %s584_s22 = scalar_select %p86_p7, %s499_s11, %s88_s18  }
   0xd   : > { %p139_p10 = pnand %p359_p6, %p138_p9 }
   0xe   : > { %p164_p11 = scmp.lt.s32.totalorder (!%p139_p10), %s503_s12, 1  ;;  %s513_s30 = smov (!%p139_p10), 4  }
   0xf   : > { %142 = sbr.rel (%p139_p10) target bundleno = 282 (0x11a), region = 28  ;;  %s514_s3 = smov (!%p139_p10), 8  }
  0x10   : > { %s161_s6 = sand.u32 (!%p139_p10), 1, %s495_s10   ;;  %s372_s8 = sshll.u32 (!%p139_p10), %s503_s12, 4 }
  0x11   : > { %s360_s7 = sshll.u32 (!%p139_p10), %s161_s6, 4  ;;  %s263_s20 = scalar_lea.hbm (!%p139_p10), %s639_s2, %s372_s8 }
  0x12   : > { %s163_s15 = scalar_lea.vmem (!%p139_p10), [#allocation2], %s360_s7  ;;  %s266_s24 = sshll.u32 (!%p139_p10), %s263_s20, 4  ;;  %s267_s24 = int_to_ptr.hbm [resolvable:$true] %s266_s24 }
  0x13   : > { %s264_s23 = sshll.u32 (!%p139_p10), %s163_s15, 4  ;;  %s265_s23 = int_to_ptr.vmem [resolvable:$true] %s264_s23 }
  0x14   : > { %v212_v0 = vld [vmem:[%s638_s1 + $0x8] sm:$0xf]  ;;  %vm220_vm0 = vcmask 1043456   ;;  %s165_s25 = scalar_select %p164_p11, %s503_s12, 1  ;;  %vm185_vm1 = vcmask 1046528   ;;  %vm179_vm2 = vcmask 1040384  }
  0x15   : > { %363 = vmatpush.msk.msra.mxu0 %vm220_vm0, %v212_v0  ;;  %373 = vmatpush.msk.msra.mxu1 %vm220_vm0, %v212_v0  ;;  %v211_v10 = vld [vmem:[%s638_s1] sm:$0xff]  ;;  %vm205_vm3 = vcmask 31744   ;;  %vm208_vm4 = vcmask 64512   ;;  %vm213_vm5 = vcmask 97280   ;;  %vm247_vm6 = vcmask 261120  }
  0x16   : > { %s371_s26 = sshll.u32 %s165_s25, 4  ;;  %s251_s25 = scalar_lea.sflag [#allocation3], %s161_s6 }
  0x17   : > { %s168_s29 = scalar_lea.vmem %s637_s0, %s371_s26  ;;  %239 = vmatpush.msra.mxu0 %v211_v10  ;;  %374 = vmatpush.msra.mxu1 %v211_v10  ;;  %s447_s26 = sshra.s32 %s267_s24, 4  ;;  %s448_s26 = int_to_ptr.hbm [resolvable:$true] %s447_s26 }
  0x18   : > { %v173_v1 = vld [vmem:[%s168_s29] sm:$0xff]  ;;  %v174_v2 = vld [vmem:[%s168_s29 + $0x8] sm:$0xff]  ;;  %s449_s27 = scalar_lea.hbm %s448_s26, 16  ;;  %s453_s29 = scalar_lea.hbm %s639_s2, 32 }
  0x19   : > { %192 = vrot.lane.b32.xlu0 %v173_v1, %s513_s30  ;;  %v186_v3 = vrot.slane %v173_v1, 1  ;;  %v187_v4 = vrot.slane %v174_v2, 1  ;;  %v176_v7 = vrot.slane %v174_v2, 7  ;;  %v180_v8 = vrot.slane %v173_v1, 7  ;;  %p450_p12 = scmp.ne.s32.totalorder %s448_s26, %s449_s27  ;;  %p454_p1 = scmp.lt.s32.totalorder %s448_s26, %s639_s2 }
  0x1a   : > { %p455_p2 = scmp.lt.s32.totalorder %s453_s29, %s449_s27 }
  0x1b   : > { %v188_v5 = vsel %vm185_vm1, %v186_v3, %v187_v4  ;;  %v191_v6 = vsel %vm185_vm1, %v187_v4, %v186_v3  ;;  %v184_v9 = vsel %vm179_vm2, %v176_v7, %v180_v8  ;;  %v181_v11 = vsel %vm179_vm2, %v180_v8, %v176_v7  ;;  %p451_p13 = pnand %p450_p12, %p571_p4 }
  0x1c   : > { %199 = vrot.lane.b32.xlu1 %v188_v5, %s514_s3  ;;  %p456_p3 = por %p455_p2, %p454_p1 }
  0x1d   : > { %p452_p0 = pneg %p451_p13 }
  0x1f   : > { %p457_p5 = pnand %p456_p3, %p452_p0 }
  0x21   : > { %194 = vrot.lane.b32.xlu0 %v174_v2, %s513_s30 }
  0x24   : > { %201 = vrot.lane.b32.xlu1 %v191_v6, %s514_s3 }
  0x8b   : > { %v193_v12 = vpop.permute.xlu0 %192 }
  0x8c   : > { %v206_v13 = vsel %vm205_vm3, %v184_v9, %v193_v12 }
  0x8e   : > { %v200_v14 = vpop.permute.xlu1 %199 }
  0x8f   : > { %v209_v15 = vsel %vm208_vm4, %v206_v13, %v200_v14 }
  0x90   : > { %364 = vmatmul.msk.f32.vlgmr.msra.gmra.mxu0 %vm213_vm5, %v209_v15 }
  0x93   : > { %v195_v16 = vpop.permute.xlu0 %194 }
  0x94   : > { %v207_v17 = vsel %vm205_vm3, %v181_v11, %v195_v16 }
  0x96   : > { %v202_v18 = vpop.permute.xlu1 %201 }
  0x97   : > { %v210_v19 = vsel %vm208_vm4, %v207_v17, %v202_v18 }
  0x98   : > { %365 = vmatmul.msk.f32.vlgmr.msra.gmra.mxu1 %vm213_vm5, %v210_v19 }
 0x10d   : > { %v241_v20 = vpop.f32.mrf.mxu0 }
 0x10e   : > { %248 = vst.msk [vmem:[%s163_s15] sm:$0xff] %vm247_vm6, %v241_v20 }
 0x115   : > { %v244_v21 = vpop.f32.mrf.mxu1 }
 0x116   : > { %249 = vst.msk [vmem:[%s163_s15 + $0x8] sm:$0xff] %vm247_vm6, %v244_v21 }
 0x117   : > { %460 = shalt.err (!%p457_p5)
}
 0x118   : > { %s515_s5 = smov 128  }
 0x119   : > { %375 = dma.vmem_to_hbm [thread:$0]  (%p571_p4), %s265_s23, 256, %s267_s24, %s251_s25, %s515_s5, %s515_s5, %s514_s3  }
 0x11a PF: > { %p381_p6 = scmp.ge.s32.totalorder %s511_s14, 2  ;;  %s281_s6 = sand.u32 1, %s491_s9  }
 0x11b   : > { %s282_s7 = scalar_lea.sflag [#allocation3], %s281_s6 }
 0x11c   : > { %p378_p7 = pnand %p381_p6, %p578_p8 }
 0x11e   : > { %p379_p9 = pneg %p378_p7 }
 0x120   : > { %486 = dma.done.wait (%p379_p9), %s282_s7, 256  }
 0x121   : > { %488 = vsyncadd (%p379_p9), %s282_s7, 4294967040  ;;  %s15_s14 = sadd.s32 1, %s511_s14   ;;  %s642_s9 = smov %s495_s10 }
 0x122   : > { %p12_p10 = scmp.ge.s32.totalorder %s15_s14, 4   ;;  %s643_s10 = smov %s499_s11 }
 0x123   : > { %s644_s11 = smov %s584_s22  ;;  %s645_s12 = smov %s507_s13 }
 0x124   : > { %s646_s13 = smov %s648_s17  ;;  %14 = sbr.rel (!%p12_p10) target bundleno = 4 (0x4), region = 66 }
 0x129   :  { %288 = vsyncpa [#allocation3], 1 }
 0x12a   :  { %290 = vsyncpa [#allocation3 + $0x1], 1 }

</bundles_post_ra>
